<compile_context>
chip_gen: v5e
topology: v5e:2x2
jax: 0.10.0
libtpu: 0.0.40
codegen_flags: <defaults>
</compile_context>

<pallas_src>
import jax
import jax.numpy as jnp
from jax.experimental import pallas as pl
from jax.experimental.pallas import tpu as pltpu

LANES = 128


def flexsigmoid_kernel(x_ref, a_ref, b_ref, c_ref, d_ref, o_ref):
    x = x_ref[...]
    a = a_ref[...]
    b = b_ref[...]
    c = c_ref[...]
    d = d_ref[...]

    bx = b * x
    abx = jnp.abs(bx)

    # |b*x| ** c  computed as exp(c * log(|b*x|)), guarded at |b*x| == 0.
    safe = jnp.maximum(abx, jnp.float32(1e-30))
    p = jnp.where(abx > 0.0, jnp.exp(c * jnp.log(safe)), 0.0)

    # (1 + p) ** (1/c)  (1 + p >= 1, so the log is always safe).
    denom = jnp.exp(jnp.log(1.0 + p) / c)

    # EUP reciprocal + VPU multiply instead of a per-element divide.
    inv = pl.reciprocal(denom, approx=False)
    o_ref[...] = a * bx * inv + d * x


def flexsigmoid_forward(x, a, b, c, d, block_rows=512):
    """x, a, b, c, d: 1-D float32 arrays of the same length lenX."""
    n = x.shape[0]
    rows = max(1, -(-n // LANES))                     # ceil(n / 128)
    br = min(block_rows, ((rows + 7) // 8) * 8)       # clamp to problem size
    br = max(8, ((br + 7) // 8) * 8)                  # multiple of 8
    rows_padded = ((rows + br - 1) // br) * br
    n_padded = rows_padded * LANES
    pad = n_padded - n

    def pad2d(v, fill):
        return jnp.pad(v, (0, pad), constant_values=fill).reshape(rows_padded, LANES)

    # B padded with 0 and C padded with 1 keep the padded lanes finite
    # (denominator == 1, output == 0); padded lanes are sliced off below.
    x2 = pad2d(x, 0.0)
    a2 = pad2d(a, 0.0)
    b2 = pad2d(b, 0.0)
    c2 = pad2d(c, 1.0)
    d2 = pad2d(d, 0.0)

    grid = (rows_padded // br,)
    blk = pl.BlockSpec((br, LANES), lambda i: (i, 0))

    out2 = pl.pallas_call(
        flexsigmoid_kernel,
        out_shape=jax.ShapeDtypeStruct((rows_padded, LANES), jnp.float32),
        grid=grid,
        in_specs=[blk, blk, blk, blk, blk],
        out_specs=blk,
        compiler_params=pltpu.CompilerParams(
            dimension_semantics=("parallel",),
        ),
    )(x2, a2, b2, c2, d2)

    return out2.reshape(-1)[:n]


def reference_forward(x, a, b, c, d):
    """Pure-JAX mirror of the PyTorch forward."""
    bx = b * x
    denom = jnp.power(1.0 + jnp.power(jnp.abs(bx), c), 1.0 / c)
    return a * bx / denom + d * x


def init_params(key, len_x):
    """Deterministic init mirroring FlexSigmoid.__init__ uniform ranges."""
    ka, kb, kc, kd = jax.random.split(key, 4)
    a = jax.random.uniform(ka, (len_x,), jnp.float32, 2.2, 2.5)
    b = jax.random.uniform(kb, (len_x,), jnp.float32, 1.2, 1.5)
    c = jax.random.uniform(kc, (len_x,), jnp.float32, 2.2, 2.5)
    d = jax.random.uniform(kd, (len_x,), jnp.float32, 0.0, 0.1)
    return a, b, c, d


if __name__ == "__main__":
    key = jax.random.PRNGKey(0)
    kx, kp = jax.random.split(key)

    len_x = 3000  # not a multiple of 8*128 -> exercises padding + a 3-step grid
    x = jax.random.normal(kx, (len_x,), dtype=jnp.float32)
    a, b, c, d = init_params(kp, len_x)

    # small block_rows here so the test runs multiple grid steps; production
    # callers keep the default (512 rows -> 64K lane-dense elems per step).
    out = flexsigmoid_forward(x, a, b, c, d, block_rows=8)
    out = jax.block_until_ready(out)

    ref = reference_forward(x, a, b, c, d)
    assert out.shape == (len_x,)
    assert jnp.allclose(out, ref, atol=1e-5, rtol=1e-5)

    print("KERNEL_OK")
</pallas_src>

<mosaic_0001>
module attributes {stable_mosaic.version = 11 : i64} {
  func.func @flexsigmoid_kernel(%arg0: i32, %arg1: memref<8x128xf32, #tpu.memory_space<vmem>>, %arg2: memref<8x128xf32, #tpu.memory_space<vmem>>, %arg3: memref<8x128xf32, #tpu.memory_space<vmem>>, %arg4: memref<8x128xf32, #tpu.memory_space<vmem>>, %arg5: memref<8x128xf32, #tpu.memory_space<vmem>>, %arg6: memref<8x128xf32, #tpu.memory_space<vmem>>) attributes {dimension_semantics = [#tpu.dimension_semantics<parallel>], iteration_bounds = array<i64: 3>, scalar_prefetch = 0 : i64, scratch_operands = 0 : i64, tpu.core_type = #tpu.core_type<tc>, window_params = [{transform_indices = @transform_0, window_bounds = array<i64: 8, 128>}, {transform_indices = @transform_1, window_bounds = array<i64: 8, 128>}, {transform_indices = @transform_2, window_bounds = array<i64: 8, 128>}, {transform_indices = @transform_3, window_bounds = array<i64: 8, 128>}, {transform_indices = @transform_4, window_bounds = array<i64: 8, 128>}, {transform_indices = @transform_5, window_bounds = array<i64: 8, 128>}]} {
    %c0 = arith.constant 0 : index
    %c0_0 = arith.constant 0 : index
    %0 = vector.load %arg1[%c0, %c0_0] : memref<8x128xf32, #tpu.memory_space<vmem>>, vector<8x128xf32>
    %c0_1 = arith.constant 0 : index
    %c0_2 = arith.constant 0 : index
    %1 = vector.load %arg2[%c0_1, %c0_2] : memref<8x128xf32, #tpu.memory_space<vmem>>, vector<8x128xf32>
    %c0_3 = arith.constant 0 : index
    %c0_4 = arith.constant 0 : index
    %2 = vector.load %arg3[%c0_3, %c0_4] : memref<8x128xf32, #tpu.memory_space<vmem>>, vector<8x128xf32>
    %c0_5 = arith.constant 0 : index
    %c0_6 = arith.constant 0 : index
    %3 = vector.load %arg4[%c0_5, %c0_6] : memref<8x128xf32, #tpu.memory_space<vmem>>, vector<8x128xf32>
    %c0_7 = arith.constant 0 : index
    %c0_8 = arith.constant 0 : index
    %4 = vector.load %arg5[%c0_7, %c0_8] : memref<8x128xf32, #tpu.memory_space<vmem>>, vector<8x128xf32>
    %5 = arith.mulf %2, %0 : vector<8x128xf32>
    %6 = math.absf %5 : vector<8x128xf32>
    %cst = arith.constant 1.000000e-30 : f32
    %7 = vector.broadcast %cst : f32 to vector<8x128xf32>
    %8 = arith.maximumf %6, %7 : vector<8x128xf32>
    %cst_9 = arith.constant 0.000000e+00 : f32
    %9 = vector.broadcast %cst_9 : f32 to vector<8x128xf32>
    %10 = arith.cmpf ogt, %6, %9 : vector<8x128xf32>
    %11 = math.log %8 : vector<8x128xf32>
    %12 = arith.mulf %3, %11 : vector<8x128xf32>
    %13 = math.exp %12 : vector<8x128xf32>
    %cst_10 = arith.constant 0.000000e+00 : f32
    %14 = vector.broadcast %cst_10 : f32 to vector<8x128xf32>
    %15 = arith.select %10, %13, %14 : vector<8x128xi1>, vector<8x128xf32>
    %cst_11 = arith.constant 1.000000e+00 : f32
    %16 = vector.broadcast %cst_11 : f32 to vector<8x128xf32>
    %17 = arith.addf %16, %15 : vector<8x128xf32>
    %18 = math.log %17 : vector<8x128xf32>
    %19 = arith.divf %18, %3 : vector<8x128xf32>
    %20 = math.exp %19 : vector<8x128xf32>
    %21 = tpu.reciprocal %20 : vector<8x128xf32> -> vector<8x128xf32>
    %22 = arith.mulf %1, %5 : vector<8x128xf32>
    %23 = arith.mulf %22, %21 : vector<8x128xf32>
    %24 = arith.mulf %4, %0 : vector<8x128xf32>
    %25 = arith.addf %23, %24 : vector<8x128xf32>
    %c0_12 = arith.constant 0 : index
    %c0_13 = arith.constant 0 : index
    %26 = vector.load %arg6[%c0_12, %c0_13] : memref<8x128xf32, #tpu.memory_space<vmem>>, vector<8x128xf32>
    tpu.vector_store %arg6[%c0_12, %c0_13], %25 {strides = array<i32>} : memref<8x128xf32, #tpu.memory_space<vmem>>, vector<8x128xf32>,
    return
  }
  func.func @transform_0(%arg0: i32) -> (i32, i32) {
    %c0_i32 = arith.constant 0 : i32
    %c0_i32_0 = arith.constant 0 : i32
    return %arg0, %c0_i32 : i32, i32
  }
  func.func @transform_1(%arg0: i32) -> (i32, i32) {
    %c0_i32 = arith.constant 0 : i32
    %c0_i32_0 = arith.constant 0 : i32
    return %arg0, %c0_i32 : i32, i32
  }
  func.func @transform_2(%arg0: i32) -> (i32, i32) {
    %c0_i32 = arith.constant 0 : i32
    %c0_i32_0 = arith.constant 0 : i32
    return %arg0, %c0_i32 : i32, i32
  }
  func.func @transform_3(%arg0: i32) -> (i32, i32) {
    %c0_i32 = arith.constant 0 : i32
    %c0_i32_0 = arith.constant 0 : i32
    return %arg0, %c0_i32 : i32, i32
  }
  func.func @transform_4(%arg0: i32) -> (i32, i32) {
    %c0_i32 = arith.constant 0 : i32
    %c0_i32_0 = arith.constant 0 : i32
    return %arg0, %c0_i32 : i32, i32
  }
  func.func @transform_5(%arg0: i32) -> (i32, i32) {
    %c0_i32 = arith.constant 0 : i32
    %c0_i32_0 = arith.constant 0 : i32
    return %arg0, %c0_i32 : i32, i32
  }
}

</mosaic_0001>

<bundles_post_ra>
// kernel: tpu_custom_call.1
= control target key start
LH: loop header
LB: loop body
LE: loop exit
PB: predicated region body
PF: predicated region fallthrough
CT: control target
= control target key end

     0   :  { %s1207_s0 = inlined_call_operand.hbm [shape: f32[24,128], index: 0, kind: input, shape index: {}]   ;;  %s1208_s1 = inlined_call_operand.hbm [shape: f32[24,128], index: 1, kind: input, shape index: {}]   ;;  %s1209_s2 = inlined_call_operand.hbm [shape: f32[24,128], index: 2, kind: input, shape index: {}]   ;;  %s1210_s3 = inlined_call_operand.hbm [shape: f32[24,128], index: 3, kind: input, shape index: {}]   ;;  %s1211_s4 = inlined_call_operand.hbm [shape: f32[24,128], index: 4, kind: input, shape index: {}]   ;;  %s1212_s5 = inlined_call_operand.hbm [shape: f32[24,128], index: 5, kind: output, shape index: {}]  }
   0x1   :  { %1218 = sst [smem:[#allocation20_spill]] %s1208_s1 }
   0x2   :  { %1219 = sst [smem:[#allocation21_spill]] %s1210_s3 }
   0x3   :  { %10 = vsyncpa [#allocation3], 0 }
   0x4   :  { %12 = vsyncpa [#allocation3 + $0x1], 0 }
   0x5   :  { %13 = vsyncpa [#allocation6], 0 }
   0x6   :  { %15 = vsyncpa [#allocation6 + $0x1], 0 }
   0x7   :  { %16 = vsyncpa [#allocation9], 0 }
   0x8   :  { %18 = vsyncpa [#allocation9 + $0x1], 0 }
   0x9   :  { %19 = vsyncpa [#allocation4], 0 }
   0xa   :  { %21 = vsyncpa [#allocation4 + $0x1], 0  ;;  %s976_s18 = smov 0   ;;  %s978_s19 = smov 0  }
   0xb   :  { %s980_s20 = smov 0   ;;  %s982_s21 = smov 0  }
   0xc LB: > { %1220 = sst [smem:[#allocation16_spill]] %s940_s20  ;;  %s997_s22 = sadd.s32 4294967295, %s944_s21   ;;  %s944_s21 = sphi %s982_s21, %s1234_s21   ;;  %s940_s20 = sphi %s980_s20, %s1236_s20   ;;  %s936_s19 = sphi %s978_s19, %s1238_s19   ;;  %s932_s18 = sphi %s976_s18, %s1237_s18  }
   0xd   : > { %s618_s23 = sadd.s32 4294967294, %s944_s21   ;;  %s1001_s24 = sadd.s32 1, %s944_s21  }
   0xe   : > { %1221 = sst [smem:[#allocation17_spill]] %s1001_s24  ;;  %s34_s25 = sadd.s32 1, %s940_s20 }
   0xf   : > { %s31_s26 = ssub.s32 %s944_s21, %s1001_s24  ;;  %p41_p0 = scmp.ne.s32.totalorder %s940_s20, %s936_s19 }
  0x10   : > { %p32_p1 = scmp.eq.s32.totalorder %s31_s26, 0  ;;  %p42_p2 = scmp.eq.s32.totalorder %s944_s21, 0 }
  0x11   : > { %p47_p3 = scmp.ne.s32.totalorder %s936_s19, %s932_s18  ;;  %p48_p4 = scmp.eq.s32.totalorder %s997_s22, 0 }
  0x12   : > { %s1013_s27 = scalar_select %p32_p1, %s940_s20, %s34_s25  }
  0x13   : > { %p43_p5 = por %p42_p2, %p41_p0  ;;  %p1015_p6 = por %p48_p4, %p47_p3 }
  0x14   : > { %1222 = sst [smem:[#allocation18_spill]] %s1013_s27  ;;  %p175_p7 = scmp.eq.s32.totalorder %s997_s22, 2 }
  0x15   : > { %p181_p8 = scmp.eq.s32.totalorder %s618_s23, 2  ;;  %p674_p9 = scmp.lt.s32.totalorder %s944_s21, 3 }
  0x16   : > { %p1021_p10 = por %p175_p7, %p41_p0  ;;  %s1213_s6 = sand.u32 1, %s940_s20  }
  0x17   : > { %p1025_p11 = por %p181_p8, %p47_p3  ;;  %s1031_s7 = sshll.u32 %s944_s21, 3 }
  0x18   : > { %s1035_s8 = sshll.u32 %s1213_s6, 3  ;;  %p1037_p12 = pnand %p674_p9, %p43_p5 }
  0x19   : > { %s1225_s30 = scalar_select %p1025_p11, 1, 0 }
  0x1a   : > { %s220_s10 = sand.u32 1, %s944_s21   ;;  %s1228_s1 = sld [smem:[#allocation20_spill]] }
  0x1b   : > { %1226 = sst [smem:[#allocation19_spill]] %s1225_s30  ;;  %s224_s14 = scalar_lea.vmem [#allocation5], %s1035_s8 }
  0x1c   : > { %s232_s15 = sshll.u32 %s224_s14, 4  ;;  %p631_p13 = scmp.ge.s32.totalorder %s944_s21, 1  ;;  %s233_s15 = int_to_ptr.vmem [resolvable:$true] %s232_s15 }
  0x1d   : > { %s1050_s17 = scalar_lea.sflag [#allocation6], %s220_s10  ;;  %p1054_p1 = pneg %p1037_p12 }
  0x20   : > { %s228_s13 = scalar_lea.hbm %s1228_s1, %s1031_s7 }
  0x21   : > { %s230_s16 = sshll.u32 %s228_s13, 4  ;;  %s727_s13 = scalar_lea.hbm %s1228_s1, 24  ;;  %s231_s16 = int_to_ptr.hbm [resolvable:$true] %s230_s16 }
  0x22   : > { %s720_s23 = sshra.s32 %s231_s16, 4  ;;  %s721_s23 = int_to_ptr.hbm [resolvable:$true] %s720_s23 }
  0x23   : > { %s722_s25 = scalar_lea.hbm %s721_s23, 8  ;;  %p728_p4 = scmp.lt.s32.totalorder %s721_s23, %s1228_s1 }
  0x24   : > { %p723_p0 = scmp.ne.s32.totalorder %s721_s23, %s722_s25  ;;  %p729_p5 = scmp.lt.s32.totalorder %s727_s13, %s722_s25 }
  0x26   : > { %p725_p2 = pnand %p1054_p1, %p723_p0  ;;  %p730_p7 = por %p729_p5, %p728_p4 }
  0x28   : > { %p726_p3 = pneg %p725_p2 }
  0x2a   : > { %p731_p8 = pnand %p730_p7, %p726_p3 }
  0x2c   : > { %734 = shalt.err (!%p731_p8)
}
  0x2d   : > { %660 = dma.hbm_to_vmem [thread:$0]  (!%p1037_p12), %s231_s16, 128, %s233_s15, %s1050_s17  }
  0x2e   : > { %p294_p9 = scmp.lt.s32.totalorder %s944_s21, 4  ;;  %s1230_s3 = sld [smem:[#allocation21_spill]] }
  0x2f   : > { %s262_s13 = scalar_lea.vmem [#allocation8], %s1035_s8  ;;  %s1083_s1 = scalar_lea.sflag [#allocation9], %s220_s10 }
  0x30   : > { %p1076_p0 = pnand %p631_p13, %p294_p9  ;;  %s270_s14 = sshll.u32 %s262_s13, 4  ;;  %s271_s14 = int_to_ptr.vmem [resolvable:$true] %s270_s14 }
  0x34   : > { %s266_s6 = scalar_lea.hbm %s1230_s3, %s1031_s7  ;;  %s757_s12 = scalar_lea.hbm %s1230_s3, 24 }
  0x35   : > { %s268_s25 = sshll.u32 %s266_s6, 4  ;;  %s269_s25 = int_to_ptr.hbm [resolvable:$true] %s268_s25 }
  0x36   : > { %s750_s27 = sshra.s32 %s269_s25, 4  ;;  %s751_s27 = int_to_ptr.hbm [resolvable:$true] %s750_s27 }
  0x37   : > { %s752_s15 = scalar_lea.hbm %s751_s27, 8  ;;  %p758_p13 = scmp.lt.s32.totalorder %s751_s27, %s1230_s3 }
  0x38   : > { %p753_p2 = scmp.ne.s32.totalorder %s751_s27, %s752_s15  ;;  %p759_p5 = scmp.lt.s32.totalorder %s757_s12, %s752_s15 }
  0x3a   : > { %p755_p3 = pnand %p753_p2, %p1054_p1  ;;  %p760_p7 = por %p759_p5, %p758_p13 }
  0x3c   : > { %p756_p4 = pneg %p755_p3 }
  0x3e   : > { %p761_p8 = pnand %p760_p7, %p756_p4 }
  0x40   : > { %764 = shalt.err (!%p761_p8)
}
  0x41   : > { %666 = dma.hbm_to_vmem [thread:$0]  (!%p1037_p12), %s269_s25, 128, %s271_s14, %s1083_s1  }
  0x42   : > { %s209_s16 = scalar_lea.hbm %s1207_s0, %s1031_s7  ;;  %s205_s30 = scalar_lea.vmem [#allocation2], %s1035_s8 }
  0x43   : > { %s211_s11 = sshll.u32 %s209_s16, 4  ;;  %s213_s24 = sshll.u32 %s205_s30, 4  ;;  %s212_s11 = int_to_ptr.hbm [resolvable:$true] %s211_s11  ;;  %s214_s24 = int_to_ptr.vmem [resolvable:$true] %s213_s24 }
  0x44   : > { %s1232_s27 = sand.u32 1, %s940_s20   ;;  %s780_s12 = sshra.s32 %s212_s11, 4  ;;  %s781_s12 = int_to_ptr.hbm [resolvable:$true] %s780_s12 }
  0x45   : > { %s202_s15 = scalar_lea.sflag [#allocation3], %s1232_s27  ;;  %s782_s6 = scalar_lea.hbm %s781_s12, 8 }
  0x46   : > { %p783_p9 = scmp.ne.s32.totalorder %s781_s12, %s782_s6  ;;  %s787_s14 = scalar_lea.hbm %s1207_s0, 24 }
  0x47   : > { %p788_p4 = scmp.lt.s32.totalorder %s781_s12, %s1207_s0  ;;  %p789_p13 = scmp.lt.s32.totalorder %s787_s14, %s782_s6 }
  0x48   : > { %p785_p2 = pnand %p783_p9, %p1054_p1 }
  0x49   : > { %p790_p5 = por %p789_p13, %p788_p4 }
  0x4a   : > { %p786_p3 = pneg %p785_p2 }
  0x4c   : > { %p791_p7 = pnand %p790_p5, %p786_p3 }
  0x4e   : > { %794 = shalt.err (!%p791_p7)
}
  0x4f   : > { %657 = dma.hbm_to_vmem [thread:$0]  (!%p1037_p12), %s212_s11, 128, %s214_s24, %s202_s15  }
  0x50   : > { %s247_s27 = scalar_lea.hbm %s1209_s2, %s1031_s7  ;;  %s243_s25 = scalar_lea.vmem [#allocation7], %s1035_s8 }
  0x51   : > { %s249_s3 = sshll.u32 %s247_s27, 4  ;;  %s251_s20 = sshll.u32 %s243_s25, 4  ;;  %s250_s3 = int_to_ptr.hbm [resolvable:$true] %s249_s3  ;;  %s252_s20 = int_to_ptr.vmem [resolvable:$true] %s251_s20 }
  0x52   : > { %s810_s12 = sshra.s32 %s250_s3, 4  ;;  %s817_s11 = scalar_lea.hbm %s1209_s2, 24  ;;  %s811_s12 = int_to_ptr.hbm [resolvable:$true] %s810_s12 }
  0x53   : > { %s812_s6 = scalar_lea.hbm %s811_s12, 8  ;;  %p818_p3 = scmp.lt.s32.totalorder %s811_s12, %s1209_s2 }
  0x54   : > { %p813_p8 = scmp.ne.s32.totalorder %s811_s12, %s812_s6  ;;  %p819_p4 = scmp.lt.s32.totalorder %s817_s11, %s812_s6 }
  0x56   : > { %p815_p9 = pnand %p813_p8, %p1054_p1  ;;  %p820_p13 = por %p819_p4, %p818_p3 }
  0x58   : > { %p816_p2 = pneg %p815_p9 }
  0x5a   : > { %p821_p5 = pnand %p820_p13, %p816_p2 }
  0x5c   : > { %824 = shalt.err (!%p821_p5)
}
  0x5d   : > { %663 = dma.hbm_to_vmem [thread:$0]  (!%p1037_p12), %s250_s3, 128, %s252_s20, %s1050_s17  }
  0x5e   : > { %s285_s16 = scalar_lea.hbm %s1211_s4, %s1031_s7  ;;  %s281_s25 = scalar_lea.vmem [#allocation10], %s1035_s8 }
  0x5f   : > { %s287_s27 = sshll.u32 %s285_s16, 4  ;;  %s289_s14 = sshll.u32 %s281_s25, 4  ;;  %s288_s27 = int_to_ptr.hbm [resolvable:$true] %s287_s27  ;;  %s290_s14 = int_to_ptr.vmem [resolvable:$true] %s289_s14 }
  0x60   : > { %s840_s12 = sshra.s32 %s288_s27, 4  ;;  %s847_s20 = scalar_lea.hbm %s1211_s4, 24  ;;  %s841_s12 = int_to_ptr.hbm [resolvable:$true] %s840_s12 }
  0x61   : > { %s842_s6 = scalar_lea.hbm %s841_s12, 8  ;;  %p848_p2 = scmp.lt.s32.totalorder %s841_s12, %s1211_s4 }
  0x62   : > { %p843_p7 = scmp.ne.s32.totalorder %s841_s12, %s842_s6  ;;  %p849_p3 = scmp.lt.s32.totalorder %s847_s20, %s842_s6 }
  0x64   : > { %p845_p8 = pnand %p843_p7, %p1054_p1  ;;  %p850_p4 = por %p849_p3, %p848_p2 }
  0x66   : > { %p846_p9 = pneg %p845_p8 }
  0x68   : > { %p851_p13 = pnand %p850_p4, %p846_p9 }
  0x6a   : > { %854 = shalt.err (!%p851_p13)
}
  0x6b   : > { %669 = dma.hbm_to_vmem [thread:$0]  (!%p1037_p12), %s288_s27, 128, %s290_s14, %s1083_s1  }
  0x6c   : > { %298 = sbr.rel (%p1076_p0) target bundleno = 195 (0xc3), region = 40  ;;  %s1148_s7 = sand.u32 (!%p1076_p0), 1, %s936_s19  }
  0x6d   : > { %s1151_s8 = sshll.u32 (!%p1076_p0), %s1148_s7, 3  ;;  %s301_s26 = scalar_lea.sflag (!%p1076_p0), [#allocation3], %s1148_s7 }
  0x6e   : > { %s304_s24 = scalar_lea.vmem (!%p1076_p0), [#allocation2], %s1151_s8 }
  0x71   : > { %915 = dma.done.wait (%p1015_p6), %s301_s26, 128  }
  0x72   : > { %917 = vsyncadd (%p1015_p6), %s301_s26, 4294967168  ;;  %s310_s1 = sand.u32 1, %s997_s22   ;;  %s314_s23 = scalar_lea.vmem [#allocation5], %s1151_s8 }
  0x73   : > { %s311_s9 = scalar_lea.sflag [#allocation6], %s310_s1 }
  0x74   : > { %919 = dma.done.wait (%p1015_p6), %s311_s9, 256  }
  0x75   : > { %921 = vsyncadd (%p1015_p6), %s311_s9, 4294967040  ;;  %s324_s15 = scalar_lea.vmem [#allocation7], %s1151_s8  ;;  %s331_s13 = scalar_lea.sflag [#allocation9], %s310_s1 }
  0x76   : > { %s334_s30 = scalar_lea.vmem [#allocation8], %s1151_s8 }
  0x77   : > { %923 = dma.done.wait (%p1015_p6), %s331_s13, 256  }
  0x78   : > { %925 = vsyncadd (%p1015_p6), %s331_s13, 4294967040  ;;  %v392_v0 = vld [vmem:[%s304_s24] sm:$0xff]  ;;  %v395_v5 = vld [vmem:[%s334_s30] sm:$0xff]  ;;  %s639_s28 = sshll.u32 %s997_s22, 3  ;;  %s344_s16 = scalar_lea.vmem [#allocation10], %s1151_s8 }
  0x79   : > { %v394_v1 = vld [vmem:[%s324_s15] sm:$0xff]  ;;  %vm415_vm1 = vweird.f32 %v395_v5  ;;  %v421_v17 = vand.u32 2147483648, %v395_v5  ;;  %v419_v19 = vand.u32 2147483647, %v395_v5  ;;  %v393_v33 = vld [vmem:[%s314_s23] sm:$0xff]  ;;  %s457_s14 = scalar_lea.hbm %s1212_s5, %s639_s28  ;;  %s391_s12 = scalar_lea.vmem [#allocation11], %s1151_s8 }
  0x7a   : > { %v397_v2 = vmul.f32 %v394_v1, %v392_v0  ;;  %v396_v35 = vld [vmem:[%s344_s16] sm:$0xff]  ;;  %s459_s6 = sshll.u32 %s391_s12, 4  ;;  %s461_s22 = sshll.u32 %s457_s14, 4  ;;  %s460_s6 = int_to_ptr.vmem [resolvable:$true] %s459_s6  ;;  %s462_s22 = int_to_ptr.hbm [resolvable:$true] %s461_s22 }
  0x7b   : > { %v422_v20 = vor.u32 1.1754944e-38, %v421_v17  ;;  %vm420_vm4 = vcmp.eq.f32.partialorder %v419_v19, 8.507059e+37  ;;  %v443_v40 = vmul.f32 %v396_v35, %v392_v0  ;;  %s447_s10 = scalar_lea.sflag [#allocation4], %s1148_s7  ;;  %s884_s11 = sshra.s32 %s462_s22, 4  ;;  %s885_s11 = int_to_ptr.hbm [resolvable:$true] %s884_s11 }
  0x7c   : > { %v398_v3 = vand.u32 2147483647, %v397_v2  ;;  %v441_v38 = vmul.f32 %v397_v2, %v393_v33  ;;  %s886_s20 = scalar_lea.hbm %s885_s11, 8  ;;  %s890_s26 = scalar_lea.hbm %s1212_s5, 24 }
  0x7d   : > { %p887_p6 = scmp.ne.s32.totalorder %s885_s11, %s886_s20  ;;  %p891_p0 = scmp.lt.s32.totalorder %s885_s11, %s1212_s5 }
  0x7e   : > { %v399_v4 = vmax.f32 %v398_v3, 1e-30  ;;  %vm400_vm0 = vcmp.gt.f32.partialorder %v398_v3, 0.0  ;;  %p892_p5 = scmp.lt.s32.totalorder %s890_s26, %s886_s20 }
  0x7f   : > { %p888_p12 = pnand %p887_p6, %p1021_p10 }
  0x80   : > { %708 = vlog2.f32 %v399_v4  ;;  %p893_p7 = por %p892_p5, %p891_p0 }
  0x81   : > { %710 = vrcp.f32 %v395_v5  ;;  %p889_p1 = pneg %p888_p12 }
  0x83   : > { %p894_p8 = pnand %p893_p7, %p889_p1 }
  0x86   : > { %v709_v6 = vpop.eup %708 }
  0x87   : > { %v711_v7 = vpop.eup %710  ;;  %v402_v8 = vmul.f32 0.6931472, %v709_v6 }
  0x88   : > { %v411_v10 = vmul.f32 %v711_v7, %v395_v5  ;;  %vm416_vm2 = vweird.f32 %v711_v7 }
  0x89   : > { %v403_v9 = vmul.f32 %v402_v8, %v395_v5  ;;  %vm417_vm3 = vmor %vm415_vm1, %vm416_vm2 }
  0x8a   : > { %v412_v12 = vsub.f32 1.0, %v411_v10 }
  0x8b   : > { %v404_v11 = vmul.f32 1.442695, %v403_v9 }
  0x8c   : > { %v413_v13 = vmul.f32 %v711_v7, %v412_v12 }
  0x8d   : > { %712 = vpow2.f32 %v404_v11 }
  0x8e   : > { %v414_v18 = vadd.f32 %v711_v7, %v413_v13 }
  0x90   : > { %v418_v21 = vsel %vm417_vm3, %v711_v7, %v414_v18 }
  0x91   : > { %v423_v23 = vsel %vm420_vm4, %v422_v20, %v418_v21 }
  0x93   : > { %v713_v14 = vpop.eup %712 }
  0x94   : > { %v406_v15 = vsel %vm400_vm0, %v713_v14, 0.0 }
  0x95   : > { %v407_v16 = vadd.f32 1.0, %v406_v15 }
  0x97   : > { %714 = vlog2.f32 %v407_v16 }
  0x9d   : > { %v715_v22 = vpop.eup %714 }
  0x9e   : > { %v409_v24 = vmul.f32 0.6931472, %v715_v22 }
  0xa0   : > { %v424_v25 = vmul.f32 %v423_v23, %v409_v24 }
  0xa2   : > { %v425_v26 = vmul.f32 1.442695, %v424_v25 }
  0xa4   : > { %716 = vpow2.f32 %v425_v26 }
  0xaa   : > { %v717_v27 = vpop.eup %716 }
  0xab   : > { %718 = vrcp.f32 %v717_v27  ;;  %v438_v30 = vand.u32 2147483648, %v717_v27  ;;  %vm432_vm5 = vweird.f32 %v717_v27  ;;  %v436_v32 = vand.u32 2147483647, %v717_v27 }
  0xad   : > { %v439_v36 = vor.u32 1.1754944e-38, %v438_v30  ;;  %vm437_vm8 = vcmp.eq.f32.partialorder %v436_v32, 8.507059e+37 }
  0xb1   : > { %v719_v28 = vpop.eup %718 }
  0xb2   : > { %v428_v29 = vmul.f32 %v719_v28, %v717_v27  ;;  %vm433_vm6 = vweird.f32 %v719_v28 }
  0xb3   : > { %vm434_vm7 = vmor %vm432_vm5, %vm433_vm6 }
  0xb4   : > { %v429_v31 = vsub.f32 1.0, %v428_v29 }
  0xb6   : > { %v430_v34 = vmul.f32 %v719_v28, %v429_v31 }
  0xb8   : > { %v431_v37 = vadd.f32 %v719_v28, %v430_v34 }
  0xba   : > { %v435_v39 = vsel %vm434_vm7, %v719_v28, %v431_v37 }
  0xbb   : > { %v440_v41 = vsel %vm437_vm8, %v439_v36, %v435_v39 }
  0xbc   : > { %v442_v42 = vmul.f32 %v441_v38, %v440_v41 }
  0xbe   : > { %v444_v43 = vadd.f32 %v443_v40, %v442_v42 }
  0xc0   : > { %445 = vst [vmem:[%s391_s12] sm:$0xff] %v444_v43 }
  0xc1   : > { %897 = shalt.err (!%p894_p8)
}
  0xc2   : > { %652 = dma.vmem_to_hbm [thread:$0]  (%p1021_p10), %s460_s6, 128, %s462_s22, %s447_s10  }
  0xc3 PF: > { %p675_p9 = scmp.ge.s32.totalorder %s944_s21, 2  ;;  %s473_s1 = sand.u32 1, %s932_s18  }
  0xc4   : > { %s474_s9 = scalar_lea.sflag [#allocation4], %s473_s1 }
  0xc5   : > { %p671_p2 = pnand %p675_p9, %p1025_p11 }
  0xc7   : > { %p672_p3 = pneg %p671_p2 }
  0xc9   : > { %927 = dma.done.wait (%p672_p3), %s474_s9, 128  }
  0xca   : > { %929 = vsyncadd (%p672_p3), %s474_s9, 4294967168  ;;  %s1234_s21 = sld [smem:[#allocation17_spill]]  ;;  %s1237_s18 = smov %s936_s19 }
  0xcb   : > { %s1235_s23 = sld [smem:[#allocation16_spill]] }
  0xcc   : > { %s1236_s20 = sld [smem:[#allocation18_spill]] }
  0xd0   : > { %p24_p4 = scmp.ge.s32.totalorder %s1234_s21, 5  }
  0xd1   : > { %s1238_s19 = smov %s1235_s23 }
  0xd2   :  { %26 = sbr.rel (!%p24_p4) target bundleno = 12 (0xc), region = 133 }
  0xd7   :  { %480 = vsyncpa [#allocation3], 1 }
  0xd8   :  { %482 = vsyncpa [#allocation3 + $0x1], 1 }
  0xd9   :  { %483 = vsyncpa [#allocation6], 1 }
  0xda   :  { %485 = vsyncpa [#allocation6 + $0x1], 1 }
  0xdb   :  { %486 = vsyncpa [#allocation9], 1 }
  0xdc   :  { %488 = vsyncpa [#allocation9 + $0x1], 1 }
  0xdd   :  { %489 = vsyncpa [#allocation4], 1 }
  0xde   :  { %491 = vsyncpa [#allocation4 + $0x1], 1 }

</bundles_post_ra>
